<compile_context>
chip_gen: v6e
topology: v6e:2x2x1
jax: 0.10.0
libtpu: 0.0.40
codegen_flags: <defaults>
</compile_context>

<pallas_src>
import jax
import jax.numpy as jnp
from jax.experimental import pallas as pl
from jax.experimental.pallas import tpu as pltpu


def _round_up(x, m):
    return (x + m - 1) // m * m


def _binarize_kernel(x_ref, e_ref, coef_ref, o_ref):
    # x_ref:    (TB, F)  f32   batch tile (resident across the column grid axis)
    # e_ref:    (F, TC)  bf16  one-hot source-feature selector for this column tile
    # coef_ref: (4, TC)  f32   rows = [a, b, c, t]
    # o_ref:    (TB, TC) out   single lane-dense, unmasked store
    x = x_ref[...]

    # Exact 3-way bf16 split of f32 x (24 mantissa bits -> 3 x 8-bit bf16 chunks).
    # E is one-hot {0,1} (exact in bf16), so three DEFAULT-precision MXU passes
    # reproduce the f32 gather bit-exactly (vs 6 passes for Precision.HIGHEST).
    x_hi = x.astype(jnp.bfloat16)
    r1 = x - x_hi.astype(jnp.float32)
    x_mid = r1.astype(jnp.bfloat16)
    x_lo = (r1 - x_mid.astype(jnp.float32)).astype(jnp.bfloat16)

    e = e_ref[...]
    xrep = jnp.dot(x_hi, e, preferred_element_type=jnp.float32)
    xrep = xrep + jnp.dot(x_mid, e, preferred_element_type=jnp.float32)
    xrep = xrep + jnp.dot(x_lo, e, preferred_element_type=jnp.float32)

    coef = coef_ref[...]
    a = coef[0:1, :]
    b = coef[1:2, :]
    c = coef[2:3, :]
    t = coef[3:4, :]
    # Fold c into the select: saves one VPU multiply per output element.
    out = a + b * xrep + jnp.where(xrep > t, c, jnp.float32(0.0))
    o_ref[...] = out.astype(o_ref.dtype)


def _vmem_budget_bytes():
    """Generation-aware scoped-VMEM budget (half of per-core VMEM capacity)."""
    cap = 64 * 1024 * 1024  # conservative fallback = v7x per-TC capacity
    try:
        cap = int(pltpu.get_tpu_info().vmem_capacity_bytes)
    except Exception:
        pass
    return max(cap // 2, 16 * 1024 * 1024)


def _vmem_estimate_bytes(tile_b, tile_c, feat, out_bytes):
    """Double-buffered operand bytes for one grid step + in-kernel temporaries."""
    x_b = 2 * tile_b * feat * 4                      # f32 batch tile
    e_b = 2 * feat * tile_c * 2                      # bf16 one-hot table tile
    cf_b = 2 * 8 * tile_c * 4                        # (4,TC) coef, 8-sublane padded
    o_b = 2 * tile_b * tile_c * out_bytes            # output tile
    tmp = 2 * tile_b * tile_c * 4                    # xrep f32 + epilogue temps
    tmp += 3 * tile_b * _round_up(feat, 128) * 2     # bf16 split chunks
    return x_b + e_b + cf_b + o_b + tmp


def binarize_layer_forward(x, cl, cr, *, disc_num, use_not=False,
                           out_dtype=jnp.bfloat16, trim_lane_padding=True):
    """Pallas equivalent of BinarizeLayer.forward for input_dim[1] > 0.

    x:  (B, disc_num + cont_num) f32
    cl: (n, cont_num) f32   (module buffer `cl`)
    cr: (n, cont_num) f32   (module buffer `cr`)

    out_dtype: bf16 is lossless when the discrete columns are exactly {0,1}
               (all binarized columns are {0,1} by construction); pass
               jnp.float32 for arbitrary-valued discrete pass-through columns.
    trim_lane_padding: True returns exactly (B, output_dim) like the module;
               False returns the lane-padded slab (pad columns are exactly 0),
               skipping the strided column-slice HBM copy.
    """
    n, cont_num = cl.shape
    batch, feat = x.shape
    # TODO(synk): input_dim[1] == 0 branch is a pure passthrough/concat; no kernel needed.
    assert cont_num > 0, "this path mirrors the input_dim[1] > 0 branch"
    assert feat == disc_num + cont_num

    f32 = jnp.float32
    x = x.astype(f32)
    cl = cl.astype(f32)
    cr = cr.astype(f32)

    out_disc = disc_num * (2 if use_not else 1)
    cn = cont_num * n
    out_dim = out_disc + 2 * cn
    out_pad128 = _round_up(out_dim, 128)
    out_bytes = jnp.dtype(out_dtype).itemsize

    # ---- tile sizing: real byte accounting vs generation-aware VMEM budget ----
    budget = _vmem_budget_bytes()
    usable = int(0.75 * budget)

    # Batch tile: 16-row aligned (bf16 sublane packing), large enough to keep the
    # store DMA near roofline, but >= 4 grid steps for v7x dual-core pipelining.
    tile_b = max(16, min(512, _round_up(pl.cdiv(batch, 4), 16)))

    # Column tile: bounds the (F x OUT) table and output tile (target ~2048 lanes).
    n_cb = pl.cdiv(out_pad128, 2048)
    tile_c = _round_up(pl.cdiv(out_pad128, n_cb), 128)
    while _vmem_estimate_bytes(tile_b, tile_c, feat, out_bytes) > usable and tile_c > 512:
        n_cb += 1
        tile_c = _round_up(pl.cdiv(out_pad128, n_cb), 128)
    while _vmem_estimate_bytes(tile_b, tile_c, feat, out_bytes) > usable and tile_b > 16:
        tile_b = max(16, _round_up(tile_b // 2, 16))

    out_cols = n_cb * tile_c                  # lane-dense padded output width
    pad_cols = out_cols - out_dim

    # ---- constant tables (tiny, built once, VMEM-resident per column block) ----
    # E: (feat, out_cols) one-hot source-feature selector per output column (bf16 exact).
    eye_disc = jnp.eye(feat, disc_num, dtype=f32)                       # (F, disc)
    rep_cont = jnp.concatenate(
        [jnp.zeros((disc_num, cn), f32),
         jnp.repeat(jnp.eye(cont_num, dtype=f32), n, axis=1)], axis=0)  # (F, C*n)
    e_blocks = [eye_disc]
    if use_not:
        e_blocks.append(eye_disc)
    e_blocks += [rep_cont, rep_cont]
    if pad_cols:
        e_blocks.append(jnp.zeros((feat, pad_cols), f32))
    e_full = jnp.concatenate(e_blocks, axis=1).astype(jnp.bfloat16)     # (F, OC)

    # coef rows: out = a + b*xrep + (xrep > t ? c : 0)
    def seg(v, w):
        return jnp.full((w,), v, f32)

    cl_flat = jnp.transpose(cl).reshape(-1)   # column c*n + j -> cl[j, c]
    cr_flat = jnp.transpose(cr).reshape(-1)

    a_p = [seg(0.0, disc_num)]
    b_p = [seg(1.0, disc_num)]
    c_p = [seg(0.0, disc_num)]
    t_p = [seg(0.0, disc_num)]
    if use_not:                                   # 1 - x_disc
        a_p.append(seg(1.0, disc_num)); b_p.append(seg(-1.0, disc_num))
        c_p.append(seg(0.0, disc_num)); t_p.append(seg(0.0, disc_num))
    # lower bounds: Binarize(x - cl)
    a_p.append(seg(0.0, cn)); b_p.append(seg(0.0, cn))
    c_p.append(seg(1.0, cn)); t_p.append(cl_flat)
    # upper bounds: 1 - Binarize(x - cr)
    a_p.append(seg(1.0, cn)); b_p.append(seg(0.0, cn))
    c_p.append(seg(-1.0, cn)); t_p.append(cr_flat)
    if pad_cols:
        for p in (a_p, b_p, c_p, t_p):
            p.append(seg(0.0, pad_cols))
    coef = jnp.stack([jnp.concatenate(p) for p in (a_p, b_p, c_p, t_p)], axis=0)  # (4, OC)

    # ---- batch padding + grid ----
    b_pad = _round_up(batch, tile_b)
    if b_pad != batch:
        x = jnp.pad(x, ((0, b_pad - batch), (0, 0)))

    grid = (b_pad // tile_b, out_cols // tile_c)

    out = pl.pallas_call(
        _binarize_kernel,
        out_shape=jax.ShapeDtypeStruct((b_pad, out_cols), out_dtype),
        grid=grid,
        in_specs=[
            pl.BlockSpec((tile_b, feat), lambda i, j: (i, 0)),
            pl.BlockSpec((feat, tile_c), lambda i, j: (0, j)),
            pl.BlockSpec((4, tile_c), lambda i, j: (0, j)),
        ],
        out_specs=pl.BlockSpec((tile_b, tile_c), lambda i, j: (i, j)),
        compiler_params=pltpu.CompilerParams(
            dimension_semantics=("parallel", "parallel"),
            vmem_limit_bytes=int(budget)),
    )(x, e_full, coef)

    if trim_lane_padding:
        return out[:batch, :out_dim]
    return out[:batch] if b_pad != batch else out


def _reference(x, cl, cr, disc_num, use_not=False):
    """Pure-JAX replica of the PyTorch forward for verification."""
    x_disc, xc = x[:, :disc_num], x[:, disc_num:]
    if use_not:
        x_disc = jnp.concatenate([x_disc, 1.0 - x_disc], axis=1)
    xcu = xc[:, :, None]                                   # (B, C, 1)
    bl = (xcu - cl.T[None] > 0).astype(x.dtype).reshape(x.shape[0], -1)
    br = (xcu - cr.T[None] > 0).astype(x.dtype).reshape(x.shape[0], -1)
    return jnp.concatenate([x_disc, bl, 1.0 - br], axis=1)


def _run_case(key, *, n, disc_num, cont_num, batch, use_not, check_padded=False):
    k_cl, k_cr, k_xd, k_xc = jax.random.split(key, 4)
    # __init__ with left/right None: cl, cr = 3 * (2*rand(n, cont) - 1)
    cl = 3.0 * (2.0 * jax.random.uniform(k_cl, (n, cont_num), jnp.float32) - 1.0)
    cr = 3.0 * (2.0 * jax.random.uniform(k_cr, (n, cont_num), jnp.float32) - 1.0)
    # Input: discrete features in {0,1}, continuous ~ N(0, 2)
    x_disc = (jax.random.uniform(k_xd, (batch, disc_num)) > 0.5).astype(jnp.float32)
    x_cont = 2.0 * jax.random.normal(k_xc, (batch, cont_num), jnp.float32)
    x = jnp.concatenate([x_disc, x_cont], axis=1)

    ref = _reference(x, cl, cr, disc_num, use_not=use_not)

    out = binarize_layer_forward(x, cl, cr, disc_num=disc_num, use_not=use_not)
    out = jax.block_until_ready(out)
    assert out.shape == ref.shape, (out.shape, ref.shape)
    assert bool(jnp.all(out.astype(jnp.float32) == ref)), "mismatch vs pure-JAX reference"

    if check_padded:
        # Padded-slab path (no column-slice HBM copy): pad columns must be 0.
        out_p = binarize_layer_forward(x, cl, cr, disc_num=disc_num, use_not=use_not,
                                       trim_lane_padding=False)
        out_p = jax.block_until_ready(out_p)
        assert bool(jnp.all(out_p[:, :ref.shape[1]].astype(jnp.float32) == ref))
        assert bool(jnp.all(out_p[:, ref.shape[1]:] == 0))


if __name__ == "__main__":
    key = jax.random.PRNGKey(0)
    k1, k2 = jax.random.split(key)

    # Small config matching the module example: output_dim = 4 + 5*6*2 = 64
    _run_case(k1, n=5, disc_num=4, cont_num=6, batch=8, use_not=False)

    # Larger config: exercises batch padding, multi-step parallel grid, use_not,
    # and the padded-output (no column-slice) path.
    _run_case(k2, n=7, disc_num=3, cont_num=9, batch=200, use_not=True,
              check_padded=True)

    print("KERNEL_OK")
</pallas_src>

<mosaic_0001>
module attributes {stable_mosaic.version = 11 : i64} {
  func.func @_binarize_kernel(%arg0: i32, %arg1: i32, %arg2: memref<16x10xf32, #tpu.memory_space<vmem>>, %arg3: memref<10x128xbf16, #tpu.memory_space<vmem>>, %arg4: memref<4x128xf32, #tpu.memory_space<vmem>>, %arg5: memref<16x128xbf16, #tpu.memory_space<vmem>>) attributes {dimension_semantics = [#tpu.dimension_semantics<parallel>, #tpu.dimension_semantics<parallel>], iteration_bounds = array<i64: 1, 1>, scalar_prefetch = 0 : i64, scratch_operands = 0 : i64, tpu.core_type = #tpu.core_type<tc>, window_params = [{transform_indices = @transform_0, window_bounds = array<i64: 16, 10>}, {transform_indices = @transform_1, window_bounds = array<i64: 10, 128>}, {transform_indices = @transform_2, window_bounds = array<i64: 4, 128>}, {transform_indices = @transform_3, window_bounds = array<i64: 16, 128>}]} {
    %c0 = arith.constant 0 : index
    %c0_0 = arith.constant 0 : index
    %0 = vector.load %arg2[%c0, %c0_0] : memref<16x10xf32, #tpu.memory_space<vmem>>, vector<16x10xf32>
    %1 = arith.truncf %0 : vector<16x10xf32> to vector<16x10xbf16>
    %2 = arith.extf %1 : vector<16x10xbf16> to vector<16x10xf32>
    %3 = arith.subf %0, %2 : vector<16x10xf32>
    %4 = arith.truncf %3 : vector<16x10xf32> to vector<16x10xbf16>
    %5 = arith.extf %4 : vector<16x10xbf16> to vector<16x10xf32>
    %6 = arith.subf %3, %5 : vector<16x10xf32>
    %7 = arith.truncf %6 : vector<16x10xf32> to vector<16x10xbf16>
    %c0_1 = arith.constant 0 : index
    %c0_2 = arith.constant 0 : index
    %8 = vector.load %arg3[%c0_1, %c0_2] : memref<10x128xbf16, #tpu.memory_space<vmem>>, vector<10x128xbf16>
    %cst = arith.constant dense<0.000000e+00> : vector<16x128xf32>
    %9 = tpu.matmul %1, %8, %cst {dimension_numbers = #tpu.dot_dimension_numbers<[1], [0], [0], [1], [0, 0, 1, 1], [], []>} : vector<16x10xbf16>, vector<10x128xbf16>, vector<16x128xf32> -> vector<16x128xf32>
    %cst_3 = arith.constant dense<0.000000e+00> : vector<16x128xf32>
    %10 = tpu.matmul %4, %8, %cst_3 {dimension_numbers = #tpu.dot_dimension_numbers<[1], [0], [0], [1], [0, 0, 1, 1], [], []>} : vector<16x10xbf16>, vector<10x128xbf16>, vector<16x128xf32> -> vector<16x128xf32>
    %11 = arith.addf %9, %10 : vector<16x128xf32>
    %cst_4 = arith.constant dense<0.000000e+00> : vector<16x128xf32>
    %12 = tpu.matmul %7, %8, %cst_4 {dimension_numbers = #tpu.dot_dimension_numbers<[1], [0], [0], [1], [0, 0, 1, 1], [], []>} : vector<16x10xbf16>, vector<10x128xbf16>, vector<16x128xf32> -> vector<16x128xf32>
    %13 = arith.addf %11, %12 : vector<16x128xf32>
    %c0_5 = arith.constant 0 : index
    %c0_6 = arith.constant 0 : index
    %14 = vector.load %arg4[%c0_5, %c0_6] : memref<4x128xf32, #tpu.memory_space<vmem>>, vector<4x128xf32>
    %15 = vector.extract_strided_slice %14 {offsets = [0, 0], sizes = [1, 128], strides = [1, 1]} : vector<4x128xf32> to vector<1x128xf32>
    %16 = vector.extract_strided_slice %14 {offsets = [1, 0], sizes = [1, 128], strides = [1, 1]} : vector<4x128xf32> to vector<1x128xf32>
    %17 = vector.extract_strided_slice %14 {offsets = [2, 0], sizes = [1, 128], strides = [1, 1]} : vector<4x128xf32> to vector<1x128xf32>
    %18 = vector.extract_strided_slice %14 {offsets = [3, 0], sizes = [1, 128], strides = [1, 1]} : vector<4x128xf32> to vector<1x128xf32>
    %19 = vector.broadcast %16 : vector<1x128xf32> to vector<16x128xf32>
    %20 = arith.mulf %19, %13 : vector<16x128xf32>
    %21 = vector.broadcast %15 : vector<1x128xf32> to vector<16x128xf32>
    %22 = arith.addf %21, %20 : vector<16x128xf32>
    %23 = vector.broadcast %18 : vector<1x128xf32> to vector<16x128xf32>
    %24 = arith.cmpf ogt, %13, %23 : vector<16x128xf32>
    %cst_7 = arith.constant 0.000000e+00 : f32
    %25 = vector.shape_cast %17 : vector<1x128xf32> to vector<1x128xf32>
    %26 = vector.broadcast %25 : vector<1x128xf32> to vector<16x128xf32>
    %27 = vector.broadcast %cst_7 : f32 to vector<16x128xf32>
    %28 = arith.select %24, %26, %27 : vector<16x128xi1>, vector<16x128xf32>
    %29 = arith.addf %22, %28 : vector<16x128xf32>
    %30 = arith.truncf %29 : vector<16x128xf32> to vector<16x128xbf16>
    %c0_8 = arith.constant 0 : index
    %c0_9 = arith.constant 0 : index
    %31 = vector.load %arg5[%c0_8, %c0_9] : memref<16x128xbf16, #tpu.memory_space<vmem>>, vector<16x128xbf16>
    tpu.vector_store %arg5[%c0_8, %c0_9], %30 {strides = array<i32>} : memref<16x128xbf16, #tpu.memory_space<vmem>>, vector<16x128xbf16>,
    return
  }
  func.func @transform_0(%arg0: i32, %arg1: i32) -> (i32, i32) {
    %c0_i32 = arith.constant 0 : i32
    %c0_i32_0 = arith.constant 0 : i32
    return %arg0, %c0_i32 : i32, i32
  }
  func.func @transform_1(%arg0: i32, %arg1: i32) -> (i32, i32) {
    %c0_i32 = arith.constant 0 : i32
    %c0_i32_0 = arith.constant 0 : i32
    return %c0_i32, %arg1 : i32, i32
  }
  func.func @transform_2(%arg0: i32, %arg1: i32) -> (i32, i32) {
    %c0_i32 = arith.constant 0 : i32
    %c0_i32_0 = arith.constant 0 : i32
    return %c0_i32, %arg1 : i32, i32
  }
  func.func @transform_3(%arg0: i32, %arg1: i32) -> (i32, i32) {
    %c0_i32 = arith.constant 0 : i32
    return %arg0, %arg1 : i32, i32
  }
}

</mosaic_0001>

<bundles_post_ra>
// kernel: tpu_custom_call.1
= control target key start
LH: loop header
LB: loop body
LE: loop exit
PB: predicated region body
PF: predicated region fallthrough
CT: control target
= control target key end

     0   :  { %8 = vsyncpa [#allocation3], 0  ;;  %s457_s0 = inlined_call_operand.hbm [shape: f32[16,10], index: 0, kind: input, shape index: {}]   ;;  %s458_s1 = inlined_call_operand.hbm [shape: bf16[10,128], index: 1, kind: input, shape index: {}]   ;;  %s459_s2 = inlined_call_operand.hbm [shape: f32[4,128], index: 2, kind: input, shape index: {}]   ;;  %s460_s3 = inlined_call_operand.hbm [shape: bf16[16,128], index: 3, kind: output, shape index: {}]  }
   0x1   :  { %9 = vsyncpa [#allocation6], 0 }
   0x2   :  { %10 = vsyncpa [#allocation4], 0  ;;  %s403_s12 = smov [#allocation5]  }
   0x3   :  { %s28_s13 = sshll.u32 %s403_s12, 4  ;;  %s29_s13 = int_to_ptr.vmem [resolvable:$true] %s28_s13 }
   0x4   :  { %s325_s14 = scalar_lea.vmem %s29_s13, 128  ;;  %p330_p1 = scmp.lt.s32.totalorder %s29_s13, %s29_s13 }
   0x5   :  { %p326_p0 = scmp.ne.s32.totalorder %s29_s13, %s325_s14  ;;  %p331_p2 = scmp.lt.s32.totalorder %s325_s14, %s325_s14 }
   0x7   :  { %p332_p3 = por %p331_p2, %p330_p1 }
   0x9   :  { %p333_p4 = pnand %p332_p3, %p326_p0 }
   0xb   :  { %336 = shalt.err (!%p333_p4)
}
   0xc   :  { %s404_s15 = smov 64   ;;  %s405_s16 = smov 4  }
   0xd   :  { %34 = dma.hbm_to_vmem [thread:$0]  %s458_s1, 128, %s29_s13, [#allocation6], %s404_s15, %s404_s15, %s405_s16  }
   0xe   :  { %s406_s19 = smov [#allocation2]  }
   0xf   :  { %s16_s20 = sshll.u32 %s406_s19, 4  ;;  %s17_s20 = int_to_ptr.vmem [resolvable:$true] %s16_s20 }
  0x10   :  { %s345_s21 = scalar_lea.vmem %s17_s20, 256  ;;  %p350_p6 = scmp.lt.s32.totalorder %s17_s20, %s17_s20 }
  0x11   :  { %p346_p5 = scmp.ne.s32.totalorder %s17_s20, %s345_s21  ;;  %p351_p7 = scmp.lt.s32.totalorder %s345_s21, %s345_s21 }
  0x13   :  { %p352_p8 = por %p351_p7, %p350_p6 }
  0x15   :  { %p353_p9 = pnand %p352_p8, %p346_p5 }
  0x17   :  { %356 = shalt.err (!%p353_p9)
}
  0x18   :  { %s407_s22 = smov 128   ;;  %s408_s23 = smov 8  }
  0x19   :  { %22 = dma.hbm_to_vmem [thread:$0]  %s457_s0, 256, %s17_s20, [#allocation3], %s407_s22, %s407_s22, %s408_s23  }
  0x1a   :  { %s409_s26 = smov [#allocation7]  }
  0x1b   :  { %s41_s27 = sshll.u32 %s409_s26, 4  ;;  %s42_s27 = int_to_ptr.vmem [resolvable:$true] %s41_s27 }
  0x1c   :  { %s365_s1 = scalar_lea.vmem %s42_s27, 64  ;;  %p370_p11 = scmp.lt.s32.totalorder %s42_s27, %s42_s27 }
  0x1d   :  { %p366_p10 = scmp.ne.s32.totalorder %s42_s27, %s365_s1  ;;  %p371_p12 = scmp.lt.s32.totalorder %s365_s1, %s365_s1 }
  0x1f   :  { %p372_p13 = por %p371_p12, %p370_p11 }
  0x21   :  { %p373_p0 = pnand %p372_p13, %p366_p10 }
  0x23   :  { %376 = shalt.err (!%p373_p0)
}
  0x24   :  { %44 = dma.hbm_to_vmem [thread:$0]  %s459_s2, 64, %s42_s27, [#allocation6]  }
  0x25   :  { %397 = dma.done.wait [#allocation3], 256  }
  0x26   :  { %398 = vsyncadd [#allocation3], 4294967040 }
  0x27   :  { %399 = dma.done.wait [#allocation6], 192  }
  0x28   :  { %400 = vsyncadd [#allocation6], 4294967104  ;;  %v410_v0 = vmov 0.0   ;;  %vm411_vm0 = vmmov 0   ;;  %vm79_vm1 = vcmask 1044480   ;;  %v55_v2 = vld [vmem:[#allocation2] sm:$0xff]  ;;  %v215_v16 = vlaneseq }
  0x29   :  { %288 = vmatprep.subr.bf16.mxu0 %v410_v0  ;;  %294 = vmatprep.subr.bf16.mxu1 %v410_v0  ;;  %v316_v1 = vld [vmem:[#allocation5] sm:$0x1f]   ;;  %v56_v3 = vld [vmem:[#allocation2 + $0x8] sm:$0xff]  ;;  %vm75_vm2 = vcmask 80896   ;;  %v214_v26 = vld [vmem:[#allocation7] sm:$0xf] }
  0x2a   :  { %290 = vmatprep.mubr.msk.bf16.mxu0 %vm411_vm0, %v410_v0  ;;  %296 = vmatprep.mubr.msk.bf16.mxu1 %vm411_vm0, %v410_v0  ;;  %v81_v4 = vsel %vm79_vm1, %v316_v1, 0  ;;  %v57_v5 = vpack.c.bf16 %v56_v3, %v55_v2  ;;  %v216_v19 = vshrl.u32 %v215_v16, 7  ;;  %s412_s0 = smov [#allocation8]  }
  0x2b   :  { %289 = vmatpush3.bf16.msra.mxu0 %v81_v4  ;;  %295 = vmatpush3.bf16.msra.mxu1 %v81_v4  ;;  %s256_s2 = sshll.u32 %s412_s0, 4  ;;  %s257_s2 = int_to_ptr.vmem [resolvable:$true] %s256_s2 }
  0x2c   :  { %300 = vmatprep.subr.bf16.mxu0 %v410_v0  ;;  %v58_v6 = vunpack.c.l.bf16 %v57_v5  ;;  %v59_v7 = vunpack.c.h.bf16 %v57_v5  ;;  %v217_v24 = vsub.s32 1, %v216_v19  ;;  %v223_v30 = vsub.s32 0, %v216_v19  ;;  %s377_s30 = scalar_lea.vmem %s257_s2, 128  ;;  %p382_p2 = scmp.lt.s32.totalorder %s257_s2, %s257_s2 }
  0x2d   :  { %v229_v31 = vsub.s32 3, %v216_v19  ;;  %v235_v34 = vsub.s32 2, %v216_v19  ;;  %p378_p1 = scmp.ne.s32.totalorder %s257_s2, %s377_s30  ;;  %p383_p3 = scmp.lt.s32.totalorder %s377_s30, %s377_s30 }
  0x2e   :  { %v60_v8 = vsub.f32 %v55_v2, %v58_v6  ;;  %v61_v9 = vsub.f32 %v56_v3, %v59_v7  ;;  %297 = vmatmul.mubr.msk.bf16.vlgmr.msra.gmra.mxu1 %vm75_vm2, %v57_v5  ;;  %v218_v29 = vrot.slane %v214_v26, %v217_v24  ;;  %v224_v38 = vrot.slane %v214_v26, %v223_v30 }
  0x2f   :  { %v230_v39 = vrot.slane %v214_v26, %v229_v31  ;;  %v236_v42 = vrot.slane %v214_v26, %v235_v34  ;;  %p384_p4 = por %p383_p3, %p382_p2 }
  0x30   :  { %v62_v10 = vpack.c.bf16 %v61_v9, %v60_v8 }
  0x31   :  { %p385_p5 = pnand %p384_p4, %p378_p1 }
  0x32   :  { %v63_v11 = vunpack.c.l.bf16 %v62_v10  ;;  %v64_v12 = vunpack.c.h.bf16 %v62_v10  ;;  %291 = vmatmul.mubr.msk.bf16.vlgmr.msra.gmra.mxu0 %vm75_vm2, %v62_v10 }
  0x33   :  { %301 = vmatpush3.bf16.msra.mxu0 %v81_v4  ;;  %302 = vmatprep.mubr.msk.bf16.mxu0 %vm411_vm0, %v410_v0 }
  0x34   :  { %v65_v13 = vsub.f32 %v60_v8, %v63_v11  ;;  %v66_v14 = vsub.f32 %v61_v9, %v64_v12 }
  0x36   :  { %v67_v15 = vpack.c.bf16 %v66_v14, %v65_v13 }
  0x3a   :  { %303 = vmatmul.mubr.msk.bf16.vlgmr.msra.gmra.mxu0 %vm75_vm2, %v67_v15 }
  0xee   :  { %v161_v17 = vpop.f32.mrf.mxu1 }
  0xf0   :  { %v298_v18 = vpop.f32.mrf.mxu1 }
  0xf2   :  { %v117_v20 = vpop.f32.mrf.mxu0  ;;  %v164_v21 = vpop.f32.mrf.mxu1 }
  0xf3   :  { %v162_v28 = vadd.f32 %v161_v17, %v117_v20 }
  0xf4   :  { %v292_v22 = vpop.f32.mrf.mxu0  ;;  %v299_v23 = vpop.f32.mrf.mxu1 }
  0xf6   :  { %v120_v25 = vpop.f32.mrf.mxu0 }
  0xf7   :  { %v165_v36 = vadd.f32 %v164_v21, %v120_v25 }
  0xf8   :  { %v293_v27 = vpop.f32.mrf.mxu0 }
  0xfa   :  { %v205_v32 = vpop.f32.mrf.mxu0 }
  0xfb   :  { %v212_v33 = vadd.f32 %v205_v32, %v162_v28 }
  0xfc   :  { %v304_v35 = vpop.f32.mrf.mxu0 }
  0xfd   :  { %v219_v37 = vmul.f32 %v218_v29, %v212_v33  ;;  %vm231_vm3 = vcmp.gt.f32.partialorder %v212_v33, %v230_v39 }
  0xfe   :  { %v208_v40 = vpop.f32.mrf.mxu0  ;;  %v237_v47 = vsel %vm231_vm3, %v236_v42, 0.0 }
  0xff   :  { %v213_v41 = vadd.f32 %v208_v40, %v165_v36  ;;  %v225_v44 = vadd.f32 %v224_v38, %v219_v37 }
 0x100   :  { %v305_v43 = vpop.f32.mrf.mxu0 }
 0x101   :  { %v220_v45 = vmul.f32 %v218_v29, %v213_v41  ;;  %vm232_vm4 = vcmp.gt.f32.partialorder %v213_v41, %v230_v39  ;;  %v239_v49 = vadd.f32 %v237_v47, %v225_v44 }
 0x102   :  { %v238_v48 = vsel %vm232_vm4, %v236_v42, 0.0 }
 0x103   :  { %v226_v46 = vadd.f32 %v224_v38, %v220_v45 }
 0x105   :  { %v240_v50 = vadd.f32 %v238_v48, %v226_v46 }
 0x107   :  { %v280_v51 = vpack.c.bf16 %v240_v50, %v239_v49 }
 0x109   :  { %281 = vst [vmem:[#allocation8] sm:$0xff] %v280_v51  }
 0x10a   :  { %388 = shalt.err (!%p385_p5)
}
 0x10b   :  { %262 = dma.vmem_to_hbm [thread:$0]  %s257_s2, 128, %s460_s3, [#allocation4], %s404_s15, %s404_s15, %s405_s16  }
 0x10c   :  { %401 = dma.done.wait [#allocation4], 128  }
 0x10d   :  { %402 = vsyncadd [#allocation4], 4294967168 }
 0x10e   :  { %266 = vsyncpa [#allocation3], 1 }
 0x10f   :  { %267 = vsyncpa [#allocation6], 1 }
 0x110   :  { %268 = vsyncpa [#allocation4], 1 }

</bundles_post_ra>
